<compile_context>
chip_gen: v5e
topology: v5e:2x2
jax: 0.10.0
libtpu: 0.0.40
codegen_flags: <defaults>
</compile_context>

<pallas_src>
import math

import jax
import jax.numpy as jnp
from jax import lax
from jax.experimental import pallas as pl
from jax.experimental.pallas import tpu as pltpu


def _round_up(v: int, m: int) -> int:
    return ((v + m - 1) // m) * m


def _pad2d(arr, rows: int, cols: int):
    pr = rows - arr.shape[0]
    pc = cols - arr.shape[1]
    if pr == 0 and pc == 0:
        return arr
    return jnp.pad(arr, ((0, pr), (0, pc)))


def _lora_linear_kernel(x_ref, w_ref, xa_ref, b_ref, o_ref, acc_ref):
    """Grid = (M//tm, N//tn, K//tk); k (reduction) is the innermost axis.

    x_ref  : (tm, tk)       activation tile
    w_ref  : (tn, tk)       base weight tile, PyTorch (out, in) layout
    xa_ref : (tm, r_pad)    precomputed x @ A (f32, rank zero-padded to 128)
    b_ref  : (r_pad, tn)    alpha * B (f32, rank zero-padded to 128)
    o_ref  : (tm, tn)       output tile
    acc_ref: (tm, tn) f32   VMEM accumulator scratch
    """
    k = pl.program_id(2)

    @pl.when(k == 0)
    def _():
        acc_ref[...] = jnp.zeros_like(acc_ref)

    # Base (frozen) path: x_tile @ W_tile^T -- contract the K axis of both
    # operands directly, so W never needs a wrapper-side transpose.
    acc_ref[...] += lax.dot_general(
        x_ref[...], w_ref[...],
        dimension_numbers=(((1,), (1,)), ((), ())),
        preferred_element_type=jnp.float32)

    @pl.when(k == pl.num_programs(2) - 1)
    def _():
        # LoRA epilogue: one lane-dense MXU pass per output tile; alpha is
        # already folded into b_ref, xa stays in f32 (no bf16 round-trip).
        lora = jnp.dot(xa_ref[...], b_ref[...],
                       preferred_element_type=jnp.float32)
        o_ref[...] = (acc_ref[...] + lora).astype(o_ref.dtype)


def lora_linear(x, w, a, b, alpha=1.0, *, tm=256, tn=512, tk=512):
    """Pallas-backed LoRA linear.

    x : (..., in_features)
    w : (out_features, in_features)   -- PyTorch nn.Linear weight layout
    a : (in_features, rank)
    b : (rank, out_features)
    returns (..., out_features)
    """
    *lead, in_features = x.shape
    out_features, k_w = w.shape
    assert k_w == in_features, "weight / input feature mismatch"
    rank = a.shape[1]

    m = math.prod(lead) if lead else 1
    x2d = x.reshape(m, in_features)

    # LoRA down-projection: tiny (m, rank) array, computed once here so the
    # hot grid loop never recomputes x @ A per output tile. Kept in f32.
    xa = jnp.dot(x2d.astype(jnp.float32), a.astype(jnp.float32),
                 preferred_element_type=jnp.float32)
    # Fold alpha into B once (works for python floats or traced scalars; avoids
    # a full (tm, tn) VPU scale per output tile and any per-alpha recompile).
    b_alpha = jnp.asarray(alpha, jnp.float32) * b.astype(jnp.float32)

    # Tile sizes: clamp the (256/512-aligned) targets to the aligned problem size.
    tm = min(tm, _round_up(m, 8))
    tn = min(tn, _round_up(out_features, 128))
    tk = min(tk, _round_up(in_features, 128))
    r_pad = _round_up(max(rank, 1), 128)

    m_pad = _round_up(m, tm)
    n_pad = _round_up(out_features, tn)
    k_pad = _round_up(in_features, tk)

    x_p = _pad2d(x2d, m_pad, k_pad)
    w_p = _pad2d(w, n_pad, k_pad)
    xa_p = _pad2d(xa, m_pad, r_pad)
    b_p = _pad2d(b_alpha, r_pad, n_pad)

    grid = (m_pad // tm, n_pad // tn, k_pad // tk)

    out_dtype = x.dtype
    itemsize = jnp.dtype(out_dtype).itemsize
    cost = pl.CostEstimate(
        flops=2 * m_pad * n_pad * k_pad + 2 * m_pad * r_pad * n_pad,
        transcendentals=0,
        bytes_accessed=(x_p.size * x_p.dtype.itemsize
                        + w_p.size * w_p.dtype.itemsize
                        + xa_p.size * 4
                        + b_p.size * 4
                        + m_pad * n_pad * itemsize),
    )

    out_p = pl.pallas_call(
        _lora_linear_kernel,
        out_shape=jax.ShapeDtypeStruct((m_pad, n_pad), out_dtype),
        grid_spec=pltpu.PrefetchScalarGridSpec(
            num_scalar_prefetch=0,
            grid=grid,
            in_specs=[
                pl.BlockSpec((tm, tk), lambda i, j, k: (i, k)),      # x
                pl.BlockSpec((tn, tk), lambda i, j, k: (j, k)),      # W (out, in)
                pl.BlockSpec((tm, r_pad), lambda i, j, k: (i, 0)),   # x @ A
                pl.BlockSpec((r_pad, tn), lambda i, j, k: (0, j)),   # alpha * B
            ],
            out_specs=pl.BlockSpec((tm, tn), lambda i, j, k: (i, j)),
            scratch_shapes=[pltpu.VMEM((tm, tn), jnp.float32)],
        ),
        compiler_params=pltpu.CompilerParams(
            dimension_semantics=("parallel", "parallel", "arbitrary"),
            vmem_limit_bytes=48 * 1024 * 1024,
        ),
        cost_estimate=cost,
    )(x_p, w_p, xa_p, b_p)

    out = out_p[:m, :out_features]
    return out.reshape(*lead, out_features)


if __name__ == "__main__":
    # Small shapes consistent with the module: batch=2, seq=8, hidden=32, rank=8.
    batch, seq = 2, 8
    in_features, out_features, rank = 32, 32, 8
    alpha = 1.0

    key = jax.random.PRNGKey(0)
    kx, kw, ka, kb = jax.random.split(key, 4)

    x = jax.random.normal(kx, (batch, seq, in_features), dtype=jnp.float32)
    # Deterministic synthetic parameters (same init scale as the PyTorch module).
    w = jax.random.normal(kw, (out_features, in_features), dtype=jnp.float32) * 0.05
    a = jax.random.normal(ka, (in_features, rank), dtype=jnp.float32) * 1e-8
    b = jax.random.normal(kb, (rank, out_features), dtype=jnp.float32) * 1e-8

    out = lora_linear(x, w, a, b, alpha=alpha)
    jax.block_until_ready(out)

    ref = x @ w.T + alpha * ((x @ a) @ b)
    assert out.shape == (batch, seq, out_features)
    assert jnp.allclose(out, ref, atol=1e-5, rtol=1e-5)

    # Second check with non-negligible LoRA weights so the LoRA path is exercised
    # numerically (the 1e-8 init makes it vanish against the base path).
    a2, b2 = a * 1e7, b * 1e7
    out2 = lora_linear(x, w, a2, b2, alpha=0.5)
    jax.block_until_ready(out2)
    ref2 = x @ w.T + 0.5 * ((x @ a2) @ b2)
    assert jnp.allclose(out2, ref2, atol=1e-5, rtol=1e-5)

    print("KERNEL_OK")
</pallas_src>

<mosaic_0001>
module attributes {stable_mosaic.version = 11 : i64} {
  func.func @_lora_linear_kernel(%arg0: i32, %arg1: i32, %arg2: i32, %arg3: memref<16x128xf32, #tpu.memory_space<vmem>>, %arg4: memref<128x128xf32, #tpu.memory_space<vmem>>, %arg5: memref<16x128xf32, #tpu.memory_space<vmem>>, %arg6: memref<128x128xf32, #tpu.memory_space<vmem>>, %arg7: memref<16x128xf32, #tpu.memory_space<vmem>>, %arg8: memref<16x128xf32, #tpu.memory_space<vmem>>) attributes {dimension_semantics = [#tpu.dimension_semantics<parallel>, #tpu.dimension_semantics<parallel>, #tpu.dimension_semantics<arbitrary>], iteration_bounds = array<i64: 1, 1, 1>, scalar_prefetch = 0 : i64, scratch_operands = 1 : i64, tpu.core_type = #tpu.core_type<tc>, window_params = [{transform_indices = @transform_0, window_bounds = array<i64: 16, 128>}, {transform_indices = @transform_1, window_bounds = array<i64: 128, 128>}, {transform_indices = @transform_2, window_bounds = array<i64: 16, 128>}, {transform_indices = @transform_3, window_bounds = array<i64: 128, 128>}, {transform_indices = @transform_4, window_bounds = array<i64: 16, 128>}]} {
    %c0_i32 = arith.constant 0 : i32
    %0 = arith.cmpi eq, %arg2, %c0_i32 : i32
    %1 = arith.extui %0 : i1 to i32
    %c0_i32_0 = arith.constant 0 : i32
    %2 = arith.cmpi ne, %1, %c0_i32_0 : i32
    scf.if %2 {
      %cst_10 = arith.constant 0.000000e+00 : f32
      %12 = vector.broadcast %cst_10 : f32 to vector<16x128xf32>
      %c0_11 = arith.constant 0 : index
      %c0_12 = arith.constant 0 : index
      %13 = vector.load %arg8[%c0_11, %c0_12] : memref<16x128xf32, #tpu.memory_space<vmem>>, vector<16x128xf32>
      tpu.vector_store %arg8[%c0_11, %c0_12], %12 {strides = array<i32>} : memref<16x128xf32, #tpu.memory_space<vmem>>, vector<16x128xf32>,
    } else {
    }
    %c0 = arith.constant 0 : index
    %c0_1 = arith.constant 0 : index
    %3 = vector.load %arg8[%c0, %c0_1] : memref<16x128xf32, #tpu.memory_space<vmem>>, vector<16x128xf32>
    %c0_2 = arith.constant 0 : index
    %c0_3 = arith.constant 0 : index
    %4 = vector.load %arg3[%c0_2, %c0_3] : memref<16x128xf32, #tpu.memory_space<vmem>>, vector<16x128xf32>
    %c0_4 = arith.constant 0 : index
    %c0_5 = arith.constant 0 : index
    %5 = vector.load %arg4[%c0_4, %c0_5] : memref<128x128xf32, #tpu.memory_space<vmem>>, vector<128x128xf32>
    %cst = arith.constant dense<0.000000e+00> : vector<16x128xf32>
    %6 = tpu.matmul %4, %5, %cst {dimension_numbers = #tpu.dot_dimension_numbers<[1], [1], [0], [0], [0, 0, 1, 0], [], []>} : vector<16x128xf32>, vector<128x128xf32>, vector<16x128xf32> -> vector<16x128xf32>
    %7 = arith.addf %3, %6 : vector<16x128xf32>
    %c0_6 = arith.constant 0 : index
    %c0_7 = arith.constant 0 : index
    %8 = vector.load %arg8[%c0_6, %c0_7] : memref<16x128xf32, #tpu.memory_space<vmem>>, vector<16x128xf32>
    tpu.vector_store %arg8[%c0_6, %c0_7], %7 {strides = array<i32>} : memref<16x128xf32, #tpu.memory_space<vmem>>, vector<16x128xf32>,
    %c0_i32_8 = arith.constant 0 : i32
    %9 = arith.cmpi eq, %arg2, %c0_i32_8 : i32
    %10 = arith.extui %9 : i1 to i32
    %c0_i32_9 = arith.constant 0 : i32
    %11 = arith.cmpi ne, %10, %c0_i32_9 : i32
    scf.if %11 {
      %c0_10 = arith.constant 0 : index
      %c0_11 = arith.constant 0 : index
      %12 = vector.load %arg5[%c0_10, %c0_11] : memref<16x128xf32, #tpu.memory_space<vmem>>, vector<16x128xf32>
      %c0_12 = arith.constant 0 : index
      %c0_13 = arith.constant 0 : index
      %13 = vector.load %arg6[%c0_12, %c0_13] : memref<128x128xf32, #tpu.memory_space<vmem>>, vector<128x128xf32>
      %cst_14 = arith.constant dense<0.000000e+00> : vector<16x128xf32>
      %14 = tpu.matmul %12, %13, %cst_14 {dimension_numbers = #tpu.dot_dimension_numbers<[1], [0], [0], [1], [0, 0, 1, 1], [], []>} : vector<16x128xf32>, vector<128x128xf32>, vector<16x128xf32> -> vector<16x128xf32>
      %c0_15 = arith.constant 0 : index
      %c0_16 = arith.constant 0 : index
      %15 = vector.load %arg8[%c0_15, %c0_16] : memref<16x128xf32, #tpu.memory_space<vmem>>, vector<16x128xf32>
      %16 = arith.addf %15, %14 : vector<16x128xf32>
      %c0_17 = arith.constant 0 : index
      %c0_18 = arith.constant 0 : index
      %17 = vector.load %arg7[%c0_17, %c0_18] : memref<16x128xf32, #tpu.memory_space<vmem>>, vector<16x128xf32>
      tpu.vector_store %arg7[%c0_17, %c0_18], %16 {strides = array<i32>} : memref<16x128xf32, #tpu.memory_space<vmem>>, vector<16x128xf32>,
    } else {
    }
    return
  }
  func.func @transform_0(%arg0: i32, %arg1: i32, %arg2: i32) -> (i32, i32) {
    %c0_i32 = arith.constant 0 : i32
    return %arg0, %arg2 : i32, i32
  }
  func.func @transform_1(%arg0: i32, %arg1: i32, %arg2: i32) -> (i32, i32) {
    %c0_i32 = arith.constant 0 : i32
    return %arg1, %arg2 : i32, i32
  }
  func.func @transform_2(%arg0: i32, %arg1: i32, %arg2: i32) -> (i32, i32) {
    %c0_i32 = arith.constant 0 : i32
    %c0_i32_0 = arith.constant 0 : i32
    return %arg0, %c0_i32 : i32, i32
  }
  func.func @transform_3(%arg0: i32, %arg1: i32, %arg2: i32) -> (i32, i32) {
    %c0_i32 = arith.constant 0 : i32
    %c0_i32_0 = arith.constant 0 : i32
    return %c0_i32, %arg1 : i32, i32
  }
  func.func @transform_4(%arg0: i32, %arg1: i32, %arg2: i32) -> (i32, i32) {
    %c0_i32 = arith.constant 0 : i32
    return %arg0, %arg1 : i32, i32
  }
}

</mosaic_0001>

<bundles_post_ra>
// kernel: tpu_custom_call.1
= control target key start
LH: loop header
LB: loop body
LE: loop exit
PB: predicated region body
PF: predicated region fallthrough
CT: control target
= control target key end

     0   :  { %9 = vsyncpa [#allocation4], 0  ;;  %s418_s0 = inlined_call_operand.hbm [shape: f32[16,128], index: 0, kind: input, shape index: {}]   ;;  %s419_s1 = inlined_call_operand.hbm [shape: f32[128,128], index: 1, kind: input, shape index: {}]   ;;  %s420_s2 = inlined_call_operand.hbm [shape: f32[16,128], index: 2, kind: input, shape index: {}]   ;;  %s421_s3 = inlined_call_operand.hbm [shape: f32[128,128], index: 3, kind: input, shape index: {}]   ;;  %s422_s4 = inlined_call_operand.hbm [shape: f32[16,128], index: 4, kind: output, shape index: {}]  }
   0x1   :  { %10 = vsyncpa [#allocation7], 0 }
   0x2   :  { %11 = vsyncpa [#allocation10], 0 }
   0x3   :  { %12 = vsyncpa [#allocation5], 0  ;;  %s30_s17 = sshll.u32 %s419_s1, 4  ;;  %s356_s18 = smov [#allocation6]   ;;  %s31_s17 = int_to_ptr.hbm [resolvable:$true] %s30_s17 }
   0x4   :  { %s32_s19 = sshll.u32 %s356_s18, 4  ;;  %s17_s22 = sshll.u32 %s418_s0, 4  ;;  %s33_s19 = int_to_ptr.vmem [resolvable:$true] %s32_s19  ;;  %s18_s22 = int_to_ptr.hbm [resolvable:$true] %s17_s22 }
   0x5   :  { %s357_s23 = smov 128   ;;  %s358_s24 = smov 8  }
   0x6   :  { %38 = dma.hbm_to_vmem [thread:$0]  %s31_s17, 2048, %s33_s19, [#allocation7], %s357_s23, %s357_s23, %s358_s24  }
   0x7   :  { %s359_s25 = smov [#allocation3]   ;;  %s43_s1 = sshll.u32 %s420_s2, 4  ;;  %s44_s1 = int_to_ptr.hbm [resolvable:$true] %s43_s1 }
   0x8   :  { %s19_s26 = sshll.u32 %s359_s25, 4  ;;  %s56_s30 = sshll.u32 %s421_s3, 4  ;;  %s20_s26 = int_to_ptr.vmem [resolvable:$true] %s19_s26  ;;  %s57_s30 = int_to_ptr.hbm [resolvable:$true] %s56_s30 }
   0x9   :  { %25 = dma.hbm_to_vmem [thread:$0]  %s18_s22, 256, %s20_s26, [#allocation4], %s357_s23, %s357_s23, %s358_s24  }
   0xa   :  { %s360_s5 = smov [#allocation8]   ;;  %s361_s7 = smov [#allocation9]  }
   0xb   :  { %s45_s6 = sshll.u32 %s360_s5, 4  ;;  %s58_s2 = sshll.u32 %s361_s7, 4  ;;  %s46_s6 = int_to_ptr.vmem [resolvable:$true] %s45_s6  ;;  %s59_s2 = int_to_ptr.vmem [resolvable:$true] %s58_s2 }
   0xc   :  { %51 = dma.hbm_to_vmem [thread:$0]  %s44_s1, 256, %s46_s6, [#allocation7], %s357_s23, %s357_s23, %s358_s24  }
   0xd   :  { %64 = dma.hbm_to_vmem [thread:$0]  %s57_s30, 2048, %s59_s2, [#allocation10], %s357_s23, %s357_s23, %s358_s24  }
   0xe   :  { %348 = dma.done.wait [#allocation4], 256  }
   0xf   :  { %349 = vsyncadd [#allocation4], 4294967040 }
  0x10   :  { %350 = dma.done.wait [#allocation7], 2304  }
  0x11   :  { %351 = vsyncadd [#allocation7], 4294964992 }
  0x12   :  { %352 = dma.done.wait [#allocation10], 2048  }
  0x13   :  { %353 = vsyncadd [#allocation10], 4294965248  ;;  %v106_v0 = vld [vmem:[#allocation6 + $0x78] sm:$0xff]  ;;  %v105_v1 = vld [vmem:[#allocation6 + $0x70] sm:$0xff]  ;;  %s362_s3 = smov [#allocation11]   ;;  %s190_s11 = sshll.u32 %s422_s4, 4  ;;  %s191_s11 = int_to_ptr.hbm [resolvable:$true] %s190_s11 }
  0x14   :  { %107 = vmatpush.xpose.msra.mxu0 %v106_v0  ;;  %205 = vmatpush.xpose.msra.mxu2 %v106_v0  ;;  %v154_v2 = vld [vmem:[#allocation9 + $0x78] sm:$0xff]  ;;  %v153_v3 = vld [vmem:[#allocation9 + $0x70] sm:$0xff]  ;;  %v152_v4 = vld [vmem:[#allocation9 + $0x68] sm:$0xff]  ;;  %s188_s8 = sshll.u32 %s362_s3, 4  ;;  %s189_s8 = int_to_ptr.vmem [resolvable:$true] %s188_s8 }
  0x15   :  { %155 = vmatpush.msra.mxu1 %v154_v2  ;;  %v104_v5 = vld [vmem:[#allocation6 + $0x68] sm:$0xff]  ;;  %v151_v6 = vld [vmem:[#allocation9 + $0x60] sm:$0xff]  ;;  %v103_v8 = vld [vmem:[#allocation6 + $0x60] sm:$0xff] }
  0x16   :  { %v150_v7 = vld [vmem:[#allocation9 + $0x58] sm:$0xff]  ;;  %v149_v9 = vld [vmem:[#allocation9 + $0x50] sm:$0xff]  ;;  %v148_v10 = vld [vmem:[#allocation9 + $0x48] sm:$0xff] }
  0x17   :  { %156 = vmatpush.msra.mxu1 %v153_v3  ;;  %v102_v11 = vld [vmem:[#allocation6 + $0x58] sm:$0xff]  ;;  %v147_v12 = vld [vmem:[#allocation9 + $0x40] sm:$0xff]  ;;  %v146_v13 = vld [vmem:[#allocation9 + $0x38] sm:$0xff] }
  0x18   :  { %108 = vmatpush.xpose.msra.mxu0 %v105_v1  ;;  %206 = vmatpush.xpose.msra.mxu2 %v105_v1  ;;  %v101_v14 = vld [vmem:[#allocation6 + $0x50] sm:$0xff]  ;;  %v145_v15 = vld [vmem:[#allocation9 + $0x30] sm:$0xff]  ;;  %v144_v16 = vld [vmem:[#allocation9 + $0x28] sm:$0xff] }
  0x19   :  { %157 = vmatpush.msra.mxu1 %v152_v4  ;;  %v100_v17 = vld [vmem:[#allocation6 + $0x48] sm:$0xff]  ;;  %v143_v18 = vld [vmem:[#allocation9 + $0x20] sm:$0xff]  ;;  %v99_v20 = vld [vmem:[#allocation6 + $0x40] sm:$0xff] }
  0x1a   :  { %v142_v19 = vld [vmem:[#allocation9 + $0x18] sm:$0xff]  ;;  %v141_v21 = vld [vmem:[#allocation9 + $0x10] sm:$0xff]  ;;  %v140_v22 = vld [vmem:[#allocation9 + $0x8] sm:$0xff] }
  0x1b   :  { %158 = vmatpush.msra.mxu1 %v151_v6  ;;  %v98_v23 = vld [vmem:[#allocation6 + $0x38] sm:$0xff]  ;;  %v139_v24 = vld [vmem:[#allocation9] sm:$0xff]  ;;  %v137_v25 = vld [vmem:[#allocation8] sm:$0xff] }
  0x1c   :  { %109 = vmatpush.xpose.msra.mxu0 %v104_v5  ;;  %207 = vmatpush.xpose.msra.mxu2 %v104_v5  ;;  %v97_v26 = vld [vmem:[#allocation6 + $0x30] sm:$0xff]  ;;  %v96_v27 = vld [vmem:[#allocation6 + $0x28] sm:$0xff]  ;;  %v95_v29 = vld [vmem:[#allocation6 + $0x20] sm:$0xff] }
  0x1d   :  { %159 = vmatpush.msra.mxu1 %v150_v7  ;;  %v138_v28 = vld [vmem:[#allocation8 + $0x8] sm:$0xff]  ;;  %v94_v30 = vld [vmem:[#allocation6 + $0x18] sm:$0xff]  ;;  %v93_v31 = vld [vmem:[#allocation6 + $0x10] sm:$0xff] }
  0x1e   :  { %v92_v32 = vld [vmem:[#allocation6 + $0x8] sm:$0xff]  ;;  %v91_v33 = vld [vmem:[#allocation6] sm:$0xff]  ;;  %v89_v34 = vld [vmem:[#allocation3] sm:$0xff] }
  0x1f   :  { %160 = vmatpush.msra.mxu1 %v149_v9  ;;  %v90_v35 = vld [vmem:[#allocation3 + $0x8] sm:$0xff] }
  0x20   :  { %110 = vmatpush.xpose.msra.mxu0 %v103_v8  ;;  %208 = vmatpush.xpose.msra.mxu2 %v103_v8 }
  0x21   :  { %161 = vmatpush.msra.mxu1 %v148_v10 }
  0x23   :  { %162 = vmatpush.msra.mxu1 %v147_v12 }
  0x24   :  { %111 = vmatpush.xpose.msra.mxu0 %v102_v11  ;;  %209 = vmatpush.xpose.msra.mxu2 %v102_v11 }
  0x25   :  { %163 = vmatpush.msra.mxu1 %v146_v13 }
  0x27   :  { %164 = vmatpush.msra.mxu1 %v145_v15 }
  0x28   :  { %112 = vmatpush.xpose.msra.mxu0 %v101_v14  ;;  %210 = vmatpush.xpose.msra.mxu2 %v101_v14 }
  0x29   :  { %165 = vmatpush.msra.mxu1 %v144_v16 }
  0x2b   :  { %166 = vmatpush.msra.mxu1 %v143_v18 }
  0x2c   :  { %113 = vmatpush.xpose.msra.mxu0 %v100_v17  ;;  %211 = vmatpush.xpose.msra.mxu2 %v100_v17 }
  0x2d   :  { %167 = vmatpush.msra.mxu1 %v142_v19 }
  0x2f   :  { %168 = vmatpush.msra.mxu1 %v141_v21 }
  0x30   :  { %114 = vmatpush.xpose.msra.mxu0 %v99_v20  ;;  %212 = vmatpush.xpose.msra.mxu2 %v99_v20 }
  0x31   :  { %169 = vmatpush.msra.mxu1 %v140_v22 }
  0x33   :  { %170 = vmatpush.msra.mxu1 %v139_v24 }
  0x34   :  { %115 = vmatpush.xpose.msra.mxu0 %v98_v23  ;;  %213 = vmatpush.xpose.msra.mxu2 %v98_v23 }
  0x35   :  { %171 = vmatmul.f32.vlgmr.msra.gmra.mxu1 %v137_v25 }
  0x38   :  { %116 = vmatpush.xpose.msra.mxu0 %v97_v26  ;;  %214 = vmatpush.xpose.msra.mxu2 %v97_v26 }
  0x3c   :  { %117 = vmatpush.xpose.msra.mxu0 %v96_v27  ;;  %215 = vmatpush.xpose.msra.mxu2 %v96_v27 }
  0x3d   :  { %174 = vmatmul.f32.gmra.mxu1 %v138_v28 }
  0x40   :  { %118 = vmatpush.xpose.msra.mxu0 %v95_v29  ;;  %216 = vmatpush.xpose.msra.mxu2 %v95_v29 }
  0x44   :  { %119 = vmatpush.xpose.msra.mxu0 %v94_v30  ;;  %217 = vmatpush.xpose.msra.mxu2 %v94_v30 }
  0x48   :  { %120 = vmatpush.xpose.msra.mxu0 %v93_v31  ;;  %218 = vmatpush.xpose.msra.mxu2 %v93_v31 }
  0x4c   :  { %121 = vmatpush.xpose.msra.mxu0 %v92_v32  ;;  %219 = vmatpush.xpose.msra.mxu2 %v92_v32 }
  0x50   :  { %122 = vmatpush.xpose.msra.mxu0 %v91_v33  ;;  %220 = vmatpush.xpose.msra.mxu2 %v91_v33 }
  0x53   :  { %123 = vmatmul.f32.vlgmr.msra.gmra.mxu0 %v89_v34  ;;  %126 = vmatmul.f32.vlgmr.msra.gmra.mxu2 %v90_v35 }
  0xb2   :  { %v172_v36 = vpop.f32.mrf.mxu1 }
  0xba   :  { %v175_v39 = vpop.f32.mrf.mxu1 }
  0xd0   :  { %v124_v37 = vpop.f32.mrf.mxu0 }
  0xd1   :  { %v180_v38 = vadd.f32 %v172_v36, %v124_v37 }
  0xd3   :  { %182 = vst [vmem:[#allocation11] sm:$0xff] %v180_v38 }
  0xd6   :  { %v127_v40 = vpop.f32.mrf.mxu2 }
  0xd7   :  { %v181_v41 = vadd.f32 %v175_v39, %v127_v40 }
  0xd9   :  { %183 = vst [vmem:[#allocation11 + $0x8] sm:$0xff] %v181_v41 }
  0xda   :  { %196 = dma.vmem_to_hbm [thread:$0]  %s189_s8, 256, %s191_s11, [#allocation5], %s357_s23, %s357_s23, %s358_s24  }
  0xdb   :  { %354 = dma.done.wait [#allocation5], 256  }
  0xdc   :  { %355 = vsyncadd [#allocation5], 4294967040 }
  0xdd   :  { %201 = vsyncpa [#allocation4], 1 }
  0xde   :  { %202 = vsyncpa [#allocation7], 1 }
  0xdf   :  { %203 = vsyncpa [#allocation10], 1 }
  0xe0   :  { %204 = vsyncpa [#allocation5], 1 }

</bundles_post_ra>
